<compile_context>
chip_gen: v5e
topology: v5e:2x2
jax: 0.10.0
libtpu: 0.0.40
codegen_flags: <defaults>
</compile_context>

<pallas_src>
import jax
import jax.numpy as jnp
from jax.experimental import pallas as pl
from jax.experimental.pallas import tpu as pltpu


def _round_up(x, m):
    return ((x + m - 1) // m) * m


def _pick_row_tile(n_rows):
    if n_rows < 128:
        return max(8, _round_up(n_rows, 8))
    if n_rows >= 8192:
        tm = 1024
    elif n_rows >= 2048:
        tm = 512
    elif n_rows >= 512:
        tm = 256
    else:
        tm = 128
    # v7x has 2 TensorCores: keep at least 2 tiles on the "parallel" row axis.
    while tm > 128 and _round_up(n_rows, tm) // tm < 2:
        tm //= 2
    return tm


def _pick_col_tile(n_cols):
    if n_cols <= 128:
        return 128
    if n_cols >= 2048:
        return 1024
    if n_cols >= 512:
        return 512
    return 256


def _tile_vmem_bytes(tm, tn, dim, itemsize):
    # Double-buffered input tiles + norm blocks + (tm, tn) f32 intermediates
    # (gram / d2 / masked working set) + tiny outputs.
    x_bytes = 2 * tm * dim * itemsize
    y_bytes = 2 * tn * dim * itemsize
    norm_bytes = 2 * (tm * 4) + 2 * (tn * 4)
    inter_bytes = 3 * tm * tn * 4
    out_bytes = 2 * 2 * tm * 4
    return x_bytes + y_bytes + norm_bytes + inter_bytes + out_bytes


def _select_tiles(n_rows, n_cols, dim, itemsize, budget=40 << 20):
    tm = _pick_row_tile(n_rows)
    tn = _pick_col_tile(n_cols)
    # Shrink the column (reduction) tile first, then the row tile, to stay
    # inside a v7x-safe VMEM working-set budget (v7x: 64 MiB/TensorCore).
    while tn > 128 and _tile_vmem_bytes(tm, tn, dim, itemsize) > budget:
        tn //= 2
    while tm > 128 and _tile_vmem_bytes(tm, tn, dim, itemsize) > budget:
        tm //= 2
    return tm, tn


def _vmem_limit_bytes(tm, tn, dim, itemsize):
    need = _tile_vmem_bytes(tm, tn, dim, itemsize)
    # Derived from actual tile sizes; floor at the default scoped limit,
    # cap well below the v7x 64 MiB physical VMEM.
    return int(min(max(int(need * 1.5), 32 << 20), 48 << 20))


def _koleo_triplet_kernel(x_ref, y_ref, sqx_ref, sqy_ref, min_ref, max_ref):
    # x_ref:   (tm, dim) anchor row tile            (native dtype)
    # y_ref:   (tn, dim) concatenated column tile   (native dtype)
    # sqx_ref: (tm, 1)   precomputed ||x||^2 (f32)
    # sqy_ref: (1, tn)   precomputed ||y||^2 (f32, lane-dense)
    # min_ref / max_ref: (tm, 1) f32 accumulators, resident across the column axis.
    i = pl.program_id(0)
    j = pl.program_id(1)
    tm = x_ref.shape[0]
    tn = y_ref.shape[0]

    @pl.when(j == 0)
    def _():
        min_ref[...] = jnp.full(min_ref.shape, jnp.inf, dtype=min_ref.dtype)
        max_ref[...] = jnp.zeros(max_ref.shape, dtype=max_ref.dtype)  # d2 >= 0

    # MXU matmul contracting the feature axis of both operands (A . B^T form,
    # no materialized transpose), f32 accumulation.
    gram = jax.lax.dot_general(
        x_ref[...], y_ref[...],
        dimension_numbers=(((1,), (1,)), ((), ())),
        preferred_element_type=jnp.float32)                        # (tm, tn)

    # Norms arrive precomputed; sqy is already lane-dense -> pure VPU broadcast.
    d2 = jnp.maximum(sqx_ref[...] + sqy_ref[...] - 2.0 * gram, 0.0)  # (tm, tn)

    # Per-row max of raw squared distances (feeds torch's global d.max()).
    max_ref[...] = jnp.maximum(max_ref[...], jnp.max(d2, axis=1, keepdims=True))

    # Only tiles whose row/column index ranges intersect can contain the
    # anchor-anchor diagonal; gate the iota/compare mask to those tiles.
    diag_hit = jnp.logical_and(i * tm < (j + 1) * tn, j * tn < (i + 1) * tm)

    @pl.when(diag_hit)
    def _():
        row_ids = i * tm + jax.lax.broadcasted_iota(jnp.int32, (tm, 1), 0)
        col_ids = j * tn + jax.lax.broadcasted_iota(jnp.int32, (1, tn), 1)
        min_ref[...] = jnp.minimum(
            min_ref[...],
            jnp.min(jnp.where((row_ids == col_ids) | (d2 <= 0.0), jnp.inf, d2),
                    axis=1, keepdims=True))

    @pl.when(jnp.logical_not(diag_hit))
    def _():
        min_ref[...] = jnp.minimum(
            min_ref[...],
            jnp.min(jnp.where(d2 <= 0.0, jnp.inf, d2), axis=1, keepdims=True))


def koleo_triplet_loss(anchor, positive, negative):
    """Pallas implementation of KoLeoLossTriplet.forward.

    anchor: (n, dim); positive: (n_p, dim); negative: (n_n, dim).
    """
    n, dim = anchor.shape
    n_total = n + positive.shape[0] + negative.shape[0]
    itemsize = jnp.dtype(anchor.dtype).itemsize

    tm, tn = _select_tiles(n, n_total, dim, itemsize)
    m_pad = _round_up(n, tm)
    n_pad = _round_up(n_total, tn)

    # Padding fused into the concatenate (no extra edge-pad HBM pass).
    # Row padding is sliced off afterwards; column padding replicates a REAL
    # row of Y (last negative) so it never changes a row min or the global max.
    x_parts = [anchor]
    if m_pad > n:
        x_parts.append(jnp.broadcast_to(anchor[-1:], (m_pad - n, dim)))
    x_p = jnp.concatenate(x_parts, axis=0) if len(x_parts) > 1 else anchor

    y_parts = [anchor, positive, negative]
    if n_pad > n_total:
        y_parts.append(jnp.broadcast_to(negative[-1:], (n_pad - n_total, dim)))
    y_p = jnp.concatenate(y_parts, axis=0)

    # Precompute squared norms once in f32 (y-norms lane-dense).
    sqx = jnp.sum(jnp.square(x_p.astype(jnp.float32)), axis=1, keepdims=True)  # (m_pad, 1)
    sqy = jnp.sum(jnp.square(y_p.astype(jnp.float32)), axis=1)[None, :]        # (1, n_pad)

    grid = (m_pad // tm, n_pad // tn)

    min_d2, max_d2 = pl.pallas_call(
        _koleo_triplet_kernel,
        out_shape=(jax.ShapeDtypeStruct((m_pad, 1), jnp.float32),
                   jax.ShapeDtypeStruct((m_pad, 1), jnp.float32)),
        grid_spec=pltpu.PrefetchScalarGridSpec(
            num_scalar_prefetch=0,
            grid=grid,
            in_specs=[
                pl.BlockSpec((tm, dim), lambda i, j: (i, 0)),
                pl.BlockSpec((tn, dim), lambda i, j: (j, 0)),
                pl.BlockSpec((tm, 1), lambda i, j: (i, 0)),
                pl.BlockSpec((1, tn), lambda i, j: (0, j)),
            ],
            out_specs=[
                pl.BlockSpec((tm, 1), lambda i, j: (i, 0)),
                pl.BlockSpec((tm, 1), lambda i, j: (i, 0)),
            ],
        ),
        compiler_params=pltpu.CompilerParams(
            dimension_semantics=("parallel", "arbitrary"),
            vmem_limit_bytes=_vmem_limit_bytes(tm, tn, dim, itemsize),
        ),
    )(x_p, y_p, sqx, sqy)

    min_d2 = min_d2[:n, 0]
    max_d2 = max_d2[:n, 0]

    # torch semantics: zero distances are replaced by the GLOBAL max distance.
    # For rows with any non-zero distance the row min is unaffected; only fully
    # degenerate rows (everything masked) fall back to d.max().
    d_max = jnp.sqrt(jnp.max(max_d2))
    min_d = jnp.where(jnp.isinf(min_d2), d_max, jnp.sqrt(min_d2))
    return (-1.0 / n) * jnp.sum(jnp.log(min_d))


def _koleo_triplet_reference(anchor, positive, negative):
    # Pure-JAX reference mirroring the PyTorch module (direct-diff cdist).
    def cdist(a, b):
        diff = a[:, None, :].astype(jnp.float32) - b[None, :, :].astype(jnp.float32)
        return jnp.sqrt(jnp.sum(diff * diff, axis=-1))

    d = jnp.concatenate(
        [cdist(anchor, anchor), cdist(anchor, positive), cdist(anchor, negative)],
        axis=1)
    d_rm = jnp.where(d == 0.0, jnp.max(d), d)
    min_d = jnp.min(d_rm, axis=1)
    n = anchor.shape[0]
    return (-1.0 / n) * jnp.sum(jnp.log(min_d))


if __name__ == "__main__":
    key = jax.random.PRNGKey(0)
    ka, kp, kn = jax.random.split(key, 3)
    n, dim = 8, 32
    anchor = jax.random.normal(ka, (n, dim), dtype=jnp.float32)
    positive = jax.random.normal(kp, (n, dim), dtype=jnp.float32)
    negative = jax.random.normal(kn, (n, dim), dtype=jnp.float32)

    loss = koleo_triplet_loss(anchor, positive, negative)
    jax.block_until_ready(loss)

    ref = _koleo_triplet_reference(anchor, positive, negative)
    assert jnp.allclose(loss, ref, rtol=1e-4, atol=1e-4), (loss, ref)

    print("KERNEL_OK")
</pallas_src>

<mosaic_0001>
module attributes {stable_mosaic.version = 11 : i64} {
  func.func @_koleo_triplet_kernel(%arg0: i32, %arg1: i32, %arg2: memref<8x32xf32, #tpu.memory_space<vmem>>, %arg3: memref<128x32xf32, #tpu.memory_space<vmem>>, %arg4: memref<8x1xf32, #tpu.memory_space<vmem>>, %arg5: memref<1x128xf32, #tpu.memory_space<vmem>>, %arg6: memref<8x1xf32, #tpu.memory_space<vmem>>, %arg7: memref<8x1xf32, #tpu.memory_space<vmem>>) attributes {dimension_semantics = [#tpu.dimension_semantics<parallel>, #tpu.dimension_semantics<arbitrary>], iteration_bounds = array<i64: 1, 1>, scalar_prefetch = 0 : i64, scratch_operands = 0 : i64, tpu.core_type = #tpu.core_type<tc>, window_params = [{transform_indices = @transform_0, window_bounds = array<i64: 8, 32>}, {transform_indices = @transform_1, window_bounds = array<i64: 128, 32>}, {transform_indices = @transform_2, window_bounds = array<i64: 8, 1>}, {transform_indices = @transform_3, window_bounds = array<i64: 1, 128>}, {transform_indices = @transform_4, window_bounds = array<i64: 8, 1>}, {transform_indices = @transform_5, window_bounds = array<i64: 8, 1>}]} {
    %c0_i32 = arith.constant 0 : i32
    %0 = arith.cmpi eq, %arg1, %c0_i32 : i32
    %1 = arith.extui %0 : i1 to i32
    %c0_i32_0 = arith.constant 0 : i32
    %2 = arith.cmpi ne, %1, %c0_i32_0 : i32
    scf.if %2 {
      %cst_20 = arith.constant 0x7F800000 : f32
      %35 = vector.broadcast %cst_20 : f32 to vector<8x1xf32>
      %c0_21 = arith.constant 0 : index
      %c0_22 = arith.constant 0 : index
      %36 = vector.load %arg6[%c0_21, %c0_22] : memref<8x1xf32, #tpu.memory_space<vmem>>, vector<8x1xf32>
      tpu.vector_store %arg6[%c0_21, %c0_22], %35 {strides = array<i32>} : memref<8x1xf32, #tpu.memory_space<vmem>>, vector<8x1xf32>,
      %cst_23 = arith.constant 0.000000e+00 : f32
      %37 = vector.broadcast %cst_23 : f32 to vector<8x1xf32>
      %c0_24 = arith.constant 0 : index
      %c0_25 = arith.constant 0 : index
      %38 = vector.load %arg7[%c0_24, %c0_25] : memref<8x1xf32, #tpu.memory_space<vmem>>, vector<8x1xf32>
      tpu.vector_store %arg7[%c0_24, %c0_25], %37 {strides = array<i32>} : memref<8x1xf32, #tpu.memory_space<vmem>>, vector<8x1xf32>,
    } else {
    }
    %c0 = arith.constant 0 : index
    %c0_1 = arith.constant 0 : index
    %3 = vector.load %arg2[%c0, %c0_1] : memref<8x32xf32, #tpu.memory_space<vmem>>, vector<8x32xf32>
    %c0_2 = arith.constant 0 : index
    %c0_3 = arith.constant 0 : index
    %4 = vector.load %arg3[%c0_2, %c0_3] : memref<128x32xf32, #tpu.memory_space<vmem>>, vector<128x32xf32>
    %cst = arith.constant dense<0.000000e+00> : vector<8x128xf32>
    %5 = tpu.matmul %3, %4, %cst {dimension_numbers = #tpu.dot_dimension_numbers<[1], [1], [0], [0], [0, 0, 1, 0], [], []>} : vector<8x32xf32>, vector<128x32xf32>, vector<8x128xf32> -> vector<8x128xf32>
    %c0_4 = arith.constant 0 : index
    %c0_5 = arith.constant 0 : index
    %6 = vector.load %arg4[%c0_4, %c0_5] : memref<8x1xf32, #tpu.memory_space<vmem>>, vector<8x1xf32>
    %c0_6 = arith.constant 0 : index
    %c0_7 = arith.constant 0 : index
    %7 = vector.load %arg5[%c0_6, %c0_7] : memref<1x128xf32, #tpu.memory_space<vmem>>, vector<1x128xf32>
    %8 = vector.broadcast %6 : vector<8x1xf32> to vector<8x128xf32>
    %9 = vector.broadcast %7 : vector<1x128xf32> to vector<8x128xf32>
    %10 = arith.addf %8, %9 : vector<8x128xf32>
    %cst_8 = arith.constant 2.000000e+00 : f32
    %11 = vector.broadcast %cst_8 : f32 to vector<8x128xf32>
    %12 = arith.mulf %11, %5 : vector<8x128xf32>
    %13 = arith.subf %10, %12 : vector<8x128xf32>
    %cst_9 = arith.constant 0.000000e+00 : f32
    %14 = vector.broadcast %cst_9 : f32 to vector<8x128xf32>
    %15 = arith.maximumf %13, %14 : vector<8x128xf32>
    %c0_10 = arith.constant 0 : index
    %c0_11 = arith.constant 0 : index
    %16 = vector.load %arg7[%c0_10, %c0_11] : memref<8x1xf32, #tpu.memory_space<vmem>>, vector<8x1xf32>
    %cst_12 = arith.constant dense<0xFF800000> : vector<8xf32>
    %17 = vector.multi_reduction <maximumf>, %15, %cst_12 [1] : vector<8x128xf32> to vector<8xf32>
    %18 = vector.shape_cast %17 : vector<8xf32> to vector<8x1xf32>
    %19 = arith.maximumf %16, %18 : vector<8x1xf32>
    %c0_13 = arith.constant 0 : index
    %c0_14 = arith.constant 0 : index
    %20 = vector.load %arg7[%c0_13, %c0_14] : memref<8x1xf32, #tpu.memory_space<vmem>>, vector<8x1xf32>
    tpu.vector_store %arg7[%c0_13, %c0_14], %19 {strides = array<i32>} : memref<8x1xf32, #tpu.memory_space<vmem>>, vector<8x1xf32>,
    %c8_i32 = arith.constant 8 : i32
    %21 = arith.muli %arg0, %c8_i32 : i32
    %c1_i32 = arith.constant 1 : i32
    %22 = arith.addi %arg1, %c1_i32 : i32
    %c128_i32 = arith.constant 128 : i32
    %23 = arith.muli %22, %c128_i32 : i32
    %24 = arith.cmpi slt, %21, %23 : i32
    %c128_i32_15 = arith.constant 128 : i32
    %25 = arith.muli %arg1, %c128_i32_15 : i32
    %c1_i32_16 = arith.constant 1 : i32
    %26 = arith.addi %arg0, %c1_i32_16 : i32
    %c8_i32_17 = arith.constant 8 : i32
    %27 = arith.muli %26, %c8_i32_17 : i32
    %28 = arith.cmpi slt, %25, %27 : i32
    %29 = arith.andi %24, %28 : i1
    %30 = arith.extui %29 : i1 to i32
    %c0_i32_18 = arith.constant 0 : i32
    %31 = arith.cmpi ne, %30, %c0_i32_18 : i32
    scf.if %31 {
      %c8_i32_20 = arith.constant 8 : i32
      %35 = arith.muli %arg0, %c8_i32_20 : i32
      %36 = tpu.iota {dimensions = array<i32: 0>} : vector<8x1xi32>
      %37 = vector.broadcast %35 : i32 to vector<8x1xi32>
      %38 = arith.addi %37, %36 : vector<8x1xi32>
      %c128_i32_21 = arith.constant 128 : i32
      %39 = arith.muli %arg1, %c128_i32_21 : i32
      %40 = tpu.iota {dimensions = array<i32: 1>} : vector<1x128xi32>
      %41 = vector.broadcast %39 : i32 to vector<1x128xi32>
      %42 = arith.addi %41, %40 : vector<1x128xi32>
      %c0_22 = arith.constant 0 : index
      %c0_23 = arith.constant 0 : index
      %43 = vector.load %arg6[%c0_22, %c0_23] : memref<8x1xf32, #tpu.memory_space<vmem>>, vector<8x1xf32>
      %44 = vector.broadcast %38 : vector<8x1xi32> to vector<8x128xi32>
      %45 = vector.broadcast %42 : vector<1x128xi32> to vector<8x128xi32>
      %46 = arith.cmpi eq, %44, %45 : vector<8x128xi32>
      %cst_24 = arith.constant 0.000000e+00 : f32
      %47 = vector.broadcast %cst_24 : f32 to vector<8x128xf32>
      %48 = arith.cmpf ole, %15, %47 : vector<8x128xf32>
      %49 = arith.ori %46, %48 : vector<8x128xi1>
      %cst_25 = arith.constant 0x7F800000 : f32
      %50 = vector.broadcast %cst_25 : f32 to vector<8x128xf32>
      %51 = arith.select %49, %50, %15 : vector<8x128xi1>, vector<8x128xf32>
      %cst_26 = arith.constant dense<0x7F800000> : vector<8xf32>
      %52 = vector.multi_reduction <minimumf>, %51, %cst_26 [1] : vector<8x128xf32> to vector<8xf32>
      %53 = vector.shape_cast %52 : vector<8xf32> to vector<8x1xf32>
      %54 = arith.minimumf %43, %53 : vector<8x1xf32>
      %c0_27 = arith.constant 0 : index
      %c0_28 = arith.constant 0 : index
      %55 = vector.load %arg6[%c0_27, %c0_28] : memref<8x1xf32, #tpu.memory_space<vmem>>, vector<8x1xf32>
      tpu.vector_store %arg6[%c0_27, %c0_28], %54 {strides = array<i32>} : memref<8x1xf32, #tpu.memory_space<vmem>>, vector<8x1xf32>,
    } else {
    }
    %true = arith.constant true
    %32 = arith.xori %29, %true : i1
    %33 = arith.extui %32 : i1 to i32
    %c0_i32_19 = arith.constant 0 : i32
    %34 = arith.cmpi ne, %33, %c0_i32_19 : i32
    scf.if %34 {
      %c0_20 = arith.constant 0 : index
      %c0_21 = arith.constant 0 : index
      %35 = vector.load %arg6[%c0_20, %c0_21] : memref<8x1xf32, #tpu.memory_space<vmem>>, vector<8x1xf32>
      %cst_22 = arith.constant 0.000000e+00 : f32
      %36 = vector.broadcast %cst_22 : f32 to vector<8x128xf32>
      %37 = arith.cmpf ole, %15, %36 : vector<8x128xf32>
      %cst_23 = arith.constant 0x7F800000 : f32
      %38 = vector.broadcast %cst_23 : f32 to vector<8x128xf32>
      %39 = arith.select %37, %38, %15 : vector<8x128xi1>, vector<8x128xf32>
      %cst_24 = arith.constant dense<0x7F800000> : vector<8xf32>
      %40 = vector.multi_reduction <minimumf>, %39, %cst_24 [1] : vector<8x128xf32> to vector<8xf32>
      %41 = vector.shape_cast %40 : vector<8xf32> to vector<8x1xf32>
      %42 = arith.minimumf %35, %41 : vector<8x1xf32>
      %c0_25 = arith.constant 0 : index
      %c0_26 = arith.constant 0 : index
      %43 = vector.load %arg6[%c0_25, %c0_26] : memref<8x1xf32, #tpu.memory_space<vmem>>, vector<8x1xf32>
      tpu.vector_store %arg6[%c0_25, %c0_26], %42 {strides = array<i32>} : memref<8x1xf32, #tpu.memory_space<vmem>>, vector<8x1xf32>,
    } else {
    }
    return
  }
  func.func @transform_0(%arg0: i32, %arg1: i32) -> (i32, i32) {
    %c0_i32 = arith.constant 0 : i32
    %c0_i32_0 = arith.constant 0 : i32
    return %arg0, %c0_i32 : i32, i32
  }
  func.func @transform_1(%arg0: i32, %arg1: i32) -> (i32, i32) {
    %c0_i32 = arith.constant 0 : i32
    %c0_i32_0 = arith.constant 0 : i32
    return %arg1, %c0_i32 : i32, i32
  }
  func.func @transform_2(%arg0: i32, %arg1: i32) -> (i32, i32) {
    %c0_i32 = arith.constant 0 : i32
    %c0_i32_0 = arith.constant 0 : i32
    return %arg0, %c0_i32 : i32, i32
  }
  func.func @transform_3(%arg0: i32, %arg1: i32) -> (i32, i32) {
    %c0_i32 = arith.constant 0 : i32
    %c0_i32_0 = arith.constant 0 : i32
    return %c0_i32, %arg1 : i32, i32
  }
  func.func @transform_4(%arg0: i32, %arg1: i32) -> (i32, i32) {
    %c0_i32 = arith.constant 0 : i32
    %c0_i32_0 = arith.constant 0 : i32
    return %arg0, %c0_i32 : i32, i32
  }
  func.func @transform_5(%arg0: i32, %arg1: i32) -> (i32, i32) {
    %c0_i32 = arith.constant 0 : i32
    %c0_i32_0 = arith.constant 0 : i32
    return %arg0, %c0_i32 : i32, i32
  }
}

</mosaic_0001>

<bundles_post_ra>
// kernel: tpu_custom_call.1
= control target key start
LH: loop header
LB: loop body
LE: loop exit
PB: predicated region body
PF: predicated region fallthrough
CT: control target
= control target key end

     0   :  { %vm43_vm0 = vcmask 261120   ;;  %v204_v10 = vmov 0   ;;  %vm23_vm1 = vcmask 7168   ;;  %v205_v19 = vmov 0.0   ;;  %s333_s1 = inlined_call_operand.vmem [shape: f32[128,32], index: 1, kind: input, shape index: {}]   ;;  %s334_s3 = inlined_call_operand.vmem [shape: f32[1,128], index: 3, kind: input, shape index: {}]   ;;  %s335_s2 = inlined_call_operand.vmem [shape: f32[8,1], index: 2, kind: input, shape index: {}]   ;;  %s336_s0 = inlined_call_operand.vmem [shape: f32[8,32], index: 0, kind: input, shape index: {}]   ;;  %s337_s5 = inlined_call_operand.vmem [shape: f32[8,1], index: 5, kind: output, shape index: {1}]   ;;  %s338_s4 = inlined_call_operand.vmem [shape: f32[8,1], index: 4, kind: output, shape index: {0}]  }
   0x1   :  { %v42_v0 = vld [vmem:[%s333_s1 + $0x78] sm:$0xff]  ;;  %v41_v1 = vld [vmem:[%s333_s1 + $0x70] sm:$0xff]  ;;  %v40_v2 = vld [vmem:[%s333_s1 + $0x68] sm:$0xff]  ;;  %202 = vset.pattern.permute.xlu0 %v204_v10  ;;  %25 = vst.msk [vmem:[%s337_s5] sm:$0xff] %vm23_vm1, %v205_v19  ;;  %v147_v22 = vlaneseq  ;;  %v206_v31 = vmov inf  }
   0x2   :  { %182 = vmatpush.xpose.msk.msra.mxu0 %vm43_vm0, %v42_v0  ;;  %v39_v3 = vld [vmem:[%s333_s1 + $0x60] sm:$0xff]  ;;  %v38_v4 = vld [vmem:[%s333_s1 + $0x58] sm:$0xff]  ;;  %v37_v5 = vld [vmem:[%s333_s1 + $0x50] sm:$0xff]  ;;  %24 = vst.msk [vmem:[%s338_s4] sm:$0xff] %vm23_vm1, %v206_v31 }
   0x3   :  { %v36_v6 = vld [vmem:[%s333_s1 + $0x48] sm:$0xff]  ;;  %v35_v7 = vld [vmem:[%s333_s1 + $0x40] sm:$0xff]  ;;  %v34_v8 = vld [vmem:[%s333_s1 + $0x38] sm:$0xff]  ;;  %v148_v26 = vshrl.u32 %v147_v22, 7  ;;  %v152_v27 = vand.u32 127, %v147_v22 }
   0x4   :  { %v115_v9 = vld [vmem:[%s335_s2] sm:$0xff]  ;;  %v33_v11 = vld [vmem:[%s333_s1 + $0x30] sm:$0xff]  ;;  %v32_v12 = vld [vmem:[%s333_s1 + $0x28] sm:$0xff] }
   0x5   :  { %119 = vperm.xlu0 %202, %v115_v9   ;;  %v31_v13 = vld [vmem:[%s333_s1 + $0x20] sm:$0xff]  ;;  %v30_v14 = vld [vmem:[%s333_s1 + $0x18] sm:$0xff]  ;;  %v29_v15 = vld [vmem:[%s333_s1 + $0x10] sm:$0xff]  ;;  %vm156_vm2 = vcmp.eq.s32.totalorder %v148_v26, %v152_v27 }
   0x6   :  { %183 = vmatpush.xpose.msk.msra.mxu0 %vm43_vm0, %v41_v1  ;;  %v28_v16 = vld [vmem:[%s333_s1 + $0x8] sm:$0xff]  ;;  %v27_v17 = vld [vmem:[%s333_s1] sm:$0xff] }
   0x7   :  { %v26_v18 = vld [vmem:[%s336_s0] sm:$0xff] }
   0x8   :  { %v203_v20 = vld [vmem:[%s334_s3] ss:$0 sm:$0xff] }
   0x9   :  { %v129_v32 = vld [vmem:[%s337_s5] sm:$0xff] }
   0xa   :  { %184 = vmatpush.xpose.msk.msra.mxu0 %vm43_vm0, %v40_v2  ;;  %v155_v35 = vld [vmem:[%s338_s4] sm:$0xff] }
   0xe   :  { %185 = vmatpush.xpose.msk.msra.mxu0 %vm43_vm0, %v39_v3 }
  0x12   :  { %186 = vmatpush.xpose.msk.msra.mxu0 %vm43_vm0, %v38_v4 }
  0x16   :  { %187 = vmatpush.xpose.msk.msra.mxu0 %vm43_vm0, %v37_v5 }
  0x1a   :  { %188 = vmatpush.xpose.msk.msra.mxu0 %vm43_vm0, %v36_v6 }
  0x1e   :  { %189 = vmatpush.xpose.msk.msra.mxu0 %vm43_vm0, %v35_v7 }
  0x22   :  { %190 = vmatpush.xpose.msk.msra.mxu0 %vm43_vm0, %v34_v8 }
  0x26   :  { %191 = vmatpush.xpose.msk.msra.mxu0 %vm43_vm0, %v33_v11 }
  0x2a   :  { %192 = vmatpush.xpose.msk.msra.mxu0 %vm43_vm0, %v32_v12 }
  0x2e   :  { %193 = vmatpush.xpose.msk.msra.mxu0 %vm43_vm0, %v31_v13 }
  0x32   :  { %194 = vmatpush.xpose.msk.msra.mxu0 %vm43_vm0, %v30_v14 }
  0x36   :  { %195 = vmatpush.xpose.msk.msra.mxu0 %vm43_vm0, %v29_v15 }
  0x3a   :  { %196 = vmatpush.xpose.msk.msra.mxu0 %vm43_vm0, %v28_v16 }
  0x3e   :  { %197 = vmatpush.xpose.msk.msra.mxu0 %vm43_vm0, %v27_v17 }
  0x41   :  { %198 = vmatmul.msk.f32.vlgmr.msra.gmra.mxu0 %vm43_vm0, %v26_v18 }
  0x77   :  { %v120_v21 = vpop.permute.xlu0 %119 }
  0x78   :  { %v125_v23 = vadd.f32 %v203_v20, %v120_v21 }
  0xbe   :  { %v112_v24 = vpop.f32.mrf.mxu0 }
  0xbf   :  { %v126_v25 = vmul.f32 2.0, %v112_v24 }
  0xc1   :  { %v127_v28 = vsub.f32 %v125_v23, %v126_v25 }
  0xc3   :  { %v128_v29 = vmax.f32 %v127_v28, 0.0 }
  0xc5   :  { %130 = vmax.xlane.f32.xlu0 %v128_v29  ;;  %vm157_vm3 = vcmp.le.f32.partialorder %v128_v29, 0.0 }
  0xc6   :  { %vm158_vm4 = vmor %vm156_vm2, %vm157_vm3 }
  0xc7   :  { %v159_v30 = vsel %vm158_vm4, inf, %v128_v29 }
  0xc8   :  { %160 = vmin.xlane.f32.xlu1 %v159_v30 }
 0x138   :  { %v131_v33 = vpop.xlane.xlu0 %130 }
 0x139   :  { %v132_v34 = vmax.f32 %v129_v32, %v131_v33 }
 0x13b   :  { %134 = vst.msk [vmem:[%s337_s5] sm:$0xff] %vm23_vm1, %v132_v34  ;;  %v161_v36 = vpop.xlane.xlu1 %160 }
 0x13c   :  { %v162_v37 = vmin.f32 %v155_v35, %v161_v36 }
 0x13e   :  { %163 = vst.msk [vmem:[%s338_s4] sm:$0xff] %vm23_vm1, %v162_v37 }

</bundles_post_ra>
